<compile_context>
chip_gen: v7x
topology: tpu7x:2x2x1
jax: 0.10.0
libtpu: 0.0.40
codegen_flags: <defaults>
</compile_context>

<pallas_src>
import functools

import jax
import jax.numpy as jnp
from jax.experimental import pallas as pl
from jax.experimental.pallas import tpu as pltpu


def _channel_attention_kernel(x_ref, w1_ref, w2_ref, o_ref,
                              sum_ref, max_ref, *, hw, thw, needs_mask):
    # x_ref   : (Bt, C, thw)  spatial tile of a batch tile (native dtype)
    # w1_ref  : (Cr, C)       fc1 weight (Conv2d(C, Cr, 1) squeezed)
    # w2_ref  : (C, Cr)       fc2 weight (Conv2d(Cr, C, 1) squeezed)
    # o_ref   : (Bt, C)       sigmoid(mlp(avg) + mlp(max))
    # sum_ref : (Bt, C) f32   running spatial sum
    # max_ref : (Bt, C) f32   running spatial max
    s = pl.program_id(1)
    n_s = pl.num_programs(1)

    x = x_ref[...]                                        # (Bt, C, thw)

    if needs_mask:
        # Ragged last tile: positions >= hw are DMA padding -> mask them.
        lane = jax.lax.broadcasted_iota(jnp.int32, x.shape, 2)
        valid = (s * thw + lane) < hw
        zero = jnp.zeros((), dtype=x.dtype)
        if jnp.issubdtype(x.dtype, jnp.floating):
            fill = jnp.array(-jnp.inf, dtype=x.dtype)
        else:
            fill = jnp.array(jnp.iinfo(x.dtype).min, dtype=x.dtype)
        part_sum = jnp.sum(jnp.where(valid, x, zero), axis=-1,
                           dtype=jnp.float32)             # (Bt, C)
        part_max = jnp.max(jnp.where(valid, x, fill),
                           axis=-1).astype(jnp.float32)   # (Bt, C)
    else:
        part_sum = jnp.sum(x, axis=-1, dtype=jnp.float32)
        part_max = jnp.max(x, axis=-1).astype(jnp.float32)

    @pl.when(s == 0)
    def _():
        sum_ref[...] = part_sum
        max_ref[...] = part_max

    @pl.when(s > 0)
    def _():
        sum_ref[...] = sum_ref[...] + part_sum
        max_ref[...] = jnp.maximum(max_ref[...], part_max)

    @pl.when(s == n_s - 1)
    def _():
        bt = sum_ref.shape[0]
        mean = sum_ref[...] * (1.0 / hw)                            # (Bt, C)
        pooled = jnp.concatenate([mean, max_ref[...]], axis=0)      # (2Bt, C)
        # Shared MLP for both pooling paths in one lane-dense matmul pair.
        # Contract on the C / Cr axes directly (weights in natural layout).
        h = jax.lax.dot_general(
            pooled, w1_ref[...],
            dimension_numbers=(((1,), (1,)), ((), ())),
            preferred_element_type=jnp.float32)                     # (2Bt, Cr)
        h = jnp.maximum(h, 0.0)                                     # ReLU
        y = jax.lax.dot_general(
            h, w2_ref[...],
            dimension_numbers=(((1,), (1,)), ((), ())),
            preferred_element_type=jnp.float32)                     # (2Bt, C)
        out = y[:bt] + y[bt:]                                       # (Bt, C)
        o_ref[...] = jax.nn.sigmoid(out).astype(o_ref.dtype)


def _vmem_budgets():
    """Generation-aware (x-block budget, vmem_limit_bytes)."""
    block_budget, vmem_limit = 8 << 20, 48 << 20          # conservative default
    try:
        info = pltpu.get_tpu_info()
        cap = getattr(info, "vmem_capacity_bytes", None)
        if cap is not None:
            if cap >= (96 << 20):                          # v5e / v6e (128 MiB)
                block_budget, vmem_limit = 28 << 20, 100 << 20
            else:                                          # v7x (64 MiB)
                block_budget, vmem_limit = 10 << 20, 44 << 20
    except Exception:
        pass
    return block_budget, vmem_limit


def _pick_spatial_tile(hw, bytes_per_spatial_col, budget_bytes):
    """Return (thw, n_steps, needs_mask).

    Full extent if it fits the budget; otherwise the largest multiple-of-128
    tile that fits, with a cdiv grid and masked ragged last tile."""
    if hw * bytes_per_spatial_col <= budget_bytes:
        return hw, 1, False
    thw = max(128, (budget_bytes // bytes_per_spatial_col) // 128 * 128)
    if thw >= hw:
        return hw, 1, False
    n_steps = -(-hw // thw)
    return thw, n_steps, (n_steps * thw != hw)


def _x_block_spec(bt, c, thw, buffered):
    if buffered:
        try:
            return pl.BlockSpec((bt, c, thw), lambda b, s: (b, 0, s),
                                pipeline_mode=pl.Buffered(3))
        except TypeError:
            pass
    return pl.BlockSpec((bt, c, thw), lambda b, s: (b, 0, s))


@jax.jit
def channel_attention(x, w1, w2):
    """x: (B, C, H, W); w1: (Cr, C) fc1 weight; w2: (C, Cr) fc2 weight.
    Returns sigmoid(fc2(relu(fc1(avgpool(x)))) + fc2(relu(fc1(maxpool(x)))))
    with shape (B, C, 1, 1)."""
    B, C, H, W = x.shape
    Cr = w1.shape[0]
    HW = H * W
    x_flat = x.reshape(B, C, HW)

    # Batch tiling; pad to a multiple of 8 when B > 8 so blocks stay
    # (8,128)-legal and the batch grid axis shards cleanly.
    if B <= 8:
        bt, b_pad = B, B
    else:
        bt = 8
        b_pad = -(-B // 8) * 8
        if b_pad != B:
            x_flat = jnp.pad(x_flat, ((0, b_pad - B), (0, 0), (0, 0)))

    itemsize = jnp.dtype(x.dtype).itemsize
    block_budget, vmem_limit = _vmem_budgets()
    thw, n_s, needs_mask = _pick_spatial_tile(HW, bt * C * itemsize,
                                              block_budget)

    grid = (b_pad // bt, n_s)
    small_vmem = vmem_limit <= (48 << 20)
    x_spec = _x_block_spec(bt, C, thw, buffered=(small_vmem and n_s > 2))

    kernel = functools.partial(_channel_attention_kernel,
                               hw=HW, thw=thw, needs_mask=needs_mask)

    cost = pl.CostEstimate(
        flops=int(2 * b_pad * C * HW + 8 * b_pad * C * Cr),
        transcendentals=int(b_pad * C),
        bytes_accessed=int(b_pad * C * HW * itemsize + 2 * C * Cr * 4
                           + b_pad * C * itemsize),
    )

    out = pl.pallas_call(
        kernel,
        out_shape=jax.ShapeDtypeStruct((b_pad, C), x.dtype),
        grid_spec=pltpu.PrefetchScalarGridSpec(
            num_scalar_prefetch=0,
            grid=grid,
            in_specs=[
                x_spec,
                pl.BlockSpec((Cr, C), lambda b, s: (0, 0)),
                pl.BlockSpec((C, Cr), lambda b, s: (0, 0)),
            ],
            out_specs=pl.BlockSpec((bt, C), lambda b, s: (b, 0)),
            scratch_shapes=[
                pltpu.VMEM((bt, C), jnp.float32),   # running sum
                pltpu.VMEM((bt, C), jnp.float32),   # running max
            ],
        ),
        compiler_params=pltpu.CompilerParams(
            dimension_semantics=("parallel", "arbitrary"),
            vmem_limit_bytes=vmem_limit,
        ),
        cost_estimate=cost,
    )(x_flat, w1, w2)

    if b_pad != B:
        out = out[:B]
    return out.reshape(B, C, 1, 1)


def _reference(x, w1, w2):
    # Pure-JAX reference mirroring the PyTorch ChannelAttention module.
    avg = jnp.mean(x, axis=(2, 3), keepdims=True)          # (B,C,1,1)
    mx = jnp.max(x, axis=(2, 3), keepdims=True)            # (B,C,1,1)

    def mlp(p):  # p: (B,C,1,1)
        v = p[..., 0, 0]                                    # (B,C)
        h = jnp.maximum(v @ w1.T, 0.0)                      # (B,Cr)
        return (h @ w2.T)[..., None, None]                  # (B,C,1,1)

    return jax.nn.sigmoid(mlp(avg) + mlp(mx))


# TODO(synk): the original Segformer.forward only constructs a mix_transformer
# backbone and loads pretrained weights (no tensor math); only the
# ChannelAttention-style forward computation is expressible as a kernel.

if __name__ == "__main__":
    B, C, H, W = 2, 32, 16, 16      # in_planes=32, ratio=16 -> hidden=2
    ratio = 16
    Cr = C // ratio

    key = jax.random.PRNGKey(0)
    kx, k1, k2 = jax.random.split(key, 3)

    x = jax.random.normal(kx, (B, C, H, W), dtype=jnp.float32)
    # Deterministic weight init (shapes match nn.Conv2d(C, Cr, 1) / (Cr, C, 1)).
    w1 = jax.random.normal(k1, (Cr, C), dtype=jnp.float32) * (1.0 / jnp.sqrt(C))
    w2 = jax.random.normal(k2, (C, Cr), dtype=jnp.float32) * (1.0 / jnp.sqrt(Cr))

    out = jax.block_until_ready(channel_attention(x, w1, w2))

    ref = _reference(x, w1, w2)
    assert out.shape == (B, C, 1, 1)
    assert jnp.allclose(out, ref, atol=1e-5, rtol=1e-5), "mismatch vs reference"

    print("KERNEL_OK")
</pallas_src>

<mosaic_0001>
module attributes {stable_mosaic.version = 11 : i64} {
  func.func @_channel_attention_kernel(%arg0: i32, %arg1: i32, %arg2: memref<2x32x256xf32, #tpu.memory_space<vmem>>, %arg3: memref<2x32xf32, #tpu.memory_space<vmem>>, %arg4: memref<32x2xf32, #tpu.memory_space<vmem>>, %arg5: memref<2x32xf32, #tpu.memory_space<vmem>>, %arg6: memref<2x32xf32, #tpu.memory_space<vmem>>, %arg7: memref<2x32xf32, #tpu.memory_space<vmem>>) attributes {dimension_semantics = [#tpu.dimension_semantics<parallel>, #tpu.dimension_semantics<arbitrary>], iteration_bounds = array<i64: 1, 1>, scalar_prefetch = 0 : i64, scratch_operands = 2 : i64, tpu.core_type = #tpu.core_type<tc>, window_params = [{transform_indices = @transform_0, window_bounds = array<i64: 2, 32, 256>}, {pipeline_mode = #tpu.pipeline_mode<synchronous>, transform_indices = @transform_1, window_bounds = array<i64: 2, 32>}, {pipeline_mode = #tpu.pipeline_mode<synchronous>, transform_indices = @transform_2, window_bounds = array<i64: 32, 2>}, {transform_indices = @transform_3, window_bounds = array<i64: 2, 32>}]} {
    %c0 = arith.constant 0 : index
    %c0_0 = arith.constant 0 : index
    %c0_1 = arith.constant 0 : index
    %0 = vector.load %arg2[%c0, %c0_0, %c0_1] : memref<2x32x256xf32, #tpu.memory_space<vmem>>, vector<2x32x256xf32>
    %cst = arith.constant dense<0.000000e+00> : vector<2x32xf32>
    %1 = vector.multi_reduction <add>, %0, %cst [2] : vector<2x32x256xf32> to vector<2x32xf32>
    %cst_2 = arith.constant dense<0xFF800000> : vector<2x32xf32>
    %2 = vector.multi_reduction <maximumf>, %0, %cst_2 [2] : vector<2x32x256xf32> to vector<2x32xf32>
    %c0_i32 = arith.constant 0 : i32
    %3 = arith.cmpi eq, %arg1, %c0_i32 : i32
    %4 = arith.extui %3 : i1 to i32
    %c0_i32_3 = arith.constant 0 : i32
    %5 = arith.cmpi ne, %4, %c0_i32_3 : i32
    scf.if %5 {
      %c0_8 = arith.constant 0 : index
      %c0_9 = arith.constant 0 : index
      %12 = vector.load %arg6[%c0_8, %c0_9] : memref<2x32xf32, #tpu.memory_space<vmem>>, vector<2x32xf32>
      tpu.vector_store %arg6[%c0_8, %c0_9], %1 {strides = array<i32>} : memref<2x32xf32, #tpu.memory_space<vmem>>, vector<2x32xf32>,
      %c0_10 = arith.constant 0 : index
      %c0_11 = arith.constant 0 : index
      %13 = vector.load %arg7[%c0_10, %c0_11] : memref<2x32xf32, #tpu.memory_space<vmem>>, vector<2x32xf32>
      tpu.vector_store %arg7[%c0_10, %c0_11], %2 {strides = array<i32>} : memref<2x32xf32, #tpu.memory_space<vmem>>, vector<2x32xf32>,
    } else {
    }
    %c0_i32_4 = arith.constant 0 : i32
    %6 = arith.cmpi sgt, %arg1, %c0_i32_4 : i32
    %7 = arith.extui %6 : i1 to i32
    %c0_i32_5 = arith.constant 0 : i32
    %8 = arith.cmpi ne, %7, %c0_i32_5 : i32
    scf.if %8 {
      %c0_8 = arith.constant 0 : index
      %c0_9 = arith.constant 0 : index
      %12 = vector.load %arg6[%c0_8, %c0_9] : memref<2x32xf32, #tpu.memory_space<vmem>>, vector<2x32xf32>
      %13 = arith.addf %12, %1 : vector<2x32xf32>
      %c0_10 = arith.constant 0 : index
      %c0_11 = arith.constant 0 : index
      %14 = vector.load %arg6[%c0_10, %c0_11] : memref<2x32xf32, #tpu.memory_space<vmem>>, vector<2x32xf32>
      tpu.vector_store %arg6[%c0_10, %c0_11], %13 {strides = array<i32>} : memref<2x32xf32, #tpu.memory_space<vmem>>, vector<2x32xf32>,
      %c0_12 = arith.constant 0 : index
      %c0_13 = arith.constant 0 : index
      %15 = vector.load %arg7[%c0_12, %c0_13] : memref<2x32xf32, #tpu.memory_space<vmem>>, vector<2x32xf32>
      %16 = arith.maximumf %15, %2 : vector<2x32xf32>
      %c0_14 = arith.constant 0 : index
      %c0_15 = arith.constant 0 : index
      %17 = vector.load %arg7[%c0_14, %c0_15] : memref<2x32xf32, #tpu.memory_space<vmem>>, vector<2x32xf32>
      tpu.vector_store %arg7[%c0_14, %c0_15], %16 {strides = array<i32>} : memref<2x32xf32, #tpu.memory_space<vmem>>, vector<2x32xf32>,
    } else {
    }
    %c0_i32_6 = arith.constant 0 : i32
    %9 = arith.cmpi eq, %arg1, %c0_i32_6 : i32
    %10 = arith.extui %9 : i1 to i32
    %c0_i32_7 = arith.constant 0 : i32
    %11 = arith.cmpi ne, %10, %c0_i32_7 : i32
    scf.if %11 {
      %c0_8 = arith.constant 0 : index
      %c0_9 = arith.constant 0 : index
      %12 = vector.load %arg6[%c0_8, %c0_9] : memref<2x32xf32, #tpu.memory_space<vmem>>, vector<2x32xf32>
      %cst_10 = arith.constant 3.906250e-03 : f32
      %13 = vector.broadcast %cst_10 : f32 to vector<2x32xf32>
      %14 = arith.mulf %12, %13 : vector<2x32xf32>
      %c0_11 = arith.constant 0 : index
      %c0_12 = arith.constant 0 : index
      %15 = vector.load %arg7[%c0_11, %c0_12] : memref<2x32xf32, #tpu.memory_space<vmem>>, vector<2x32xf32>
      %16 = tpu.concatenate %14, %15 in 0 : vector<2x32xf32>, vector<2x32xf32> -> vector<4x32xf32>
      %c0_13 = arith.constant 0 : index
      %c0_14 = arith.constant 0 : index
      %17 = vector.load %arg3[%c0_13, %c0_14] : memref<2x32xf32, #tpu.memory_space<vmem>>, vector<2x32xf32>
      %cst_15 = arith.constant dense<0.000000e+00> : vector<4x2xf32>
      %18 = tpu.matmul %16, %17, %cst_15 {dimension_numbers = #tpu.dot_dimension_numbers<[1], [1], [0], [0], [0, 0, 1, 0], [], []>} : vector<4x32xf32>, vector<2x32xf32>, vector<4x2xf32> -> vector<4x2xf32>
      %cst_16 = arith.constant 0.000000e+00 : f32
      %19 = vector.broadcast %cst_16 : f32 to vector<4x2xf32>
      %20 = arith.maximumf %18, %19 : vector<4x2xf32>
      %c0_17 = arith.constant 0 : index
      %c0_18 = arith.constant 0 : index
      %21 = vector.load %arg4[%c0_17, %c0_18] : memref<32x2xf32, #tpu.memory_space<vmem>>, vector<32x2xf32>
      %cst_19 = arith.constant dense<0.000000e+00> : vector<4x32xf32>
      %22 = tpu.matmul %20, %21, %cst_19 {dimension_numbers = #tpu.dot_dimension_numbers<[1], [1], [0], [0], [0, 0, 1, 0], [], []>} : vector<4x2xf32>, vector<32x2xf32>, vector<4x32xf32> -> vector<4x32xf32>
      %23 = vector.extract_strided_slice %22 {offsets = [0, 0], sizes = [2, 32], strides = [1, 1]} : vector<4x32xf32> to vector<2x32xf32>
      %24 = vector.extract_strided_slice %22 {offsets = [2, 0], sizes = [2, 32], strides = [1, 1]} : vector<4x32xf32> to vector<2x32xf32>
      %25 = arith.addf %23, %24 : vector<2x32xf32>
      %26 = arith.negf %25 : vector<2x32xf32>
      %27 = math.exp %26 : vector<2x32xf32>
      %cst_20 = arith.constant 1.000000e+00 : f32
      %28 = vector.broadcast %cst_20 : f32 to vector<2x32xf32>
      %29 = arith.addf %28, %27 : vector<2x32xf32>
      %30 = arith.divf %28, %29 : vector<2x32xf32>
      %c0_21 = arith.constant 0 : index
      %c0_22 = arith.constant 0 : index
      %31 = vector.load %arg5[%c0_21, %c0_22] : memref<2x32xf32, #tpu.memory_space<vmem>>, vector<2x32xf32>
      tpu.vector_store %arg5[%c0_21, %c0_22], %30 {strides = array<i32>} : memref<2x32xf32, #tpu.memory_space<vmem>>, vector<2x32xf32>,
    } else {
    }
    return
  }
  func.func @transform_0(%arg0: i32, %arg1: i32) -> (i32, i32, i32) {
    %c0_i32 = arith.constant 0 : i32
    %c0_i32_0 = arith.constant 0 : i32
    return %arg0, %c0_i32, %arg1 : i32, i32, i32
  }
  func.func @transform_1(%arg0: i32, %arg1: i32) -> (i32, i32) {
    %c0_i32 = arith.constant 0 : i32
    %c0_i32_0 = arith.constant 0 : i32
    %c0_i32_1 = arith.constant 0 : i32
    return %c0_i32, %c0_i32_0 : i32, i32
  }
  func.func @transform_2(%arg0: i32, %arg1: i32) -> (i32, i32) {
    %c0_i32 = arith.constant 0 : i32
    %c0_i32_0 = arith.constant 0 : i32
    %c0_i32_1 = arith.constant 0 : i32
    return %c0_i32, %c0_i32_0 : i32, i32
  }
  func.func @transform_3(%arg0: i32, %arg1: i32) -> (i32, i32) {
    %c0_i32 = arith.constant 0 : i32
    %c0_i32_0 = arith.constant 0 : i32
    return %arg0, %c0_i32 : i32, i32
  }
}

</mosaic_0001>

<bundles_post_ra>
// kernel: channel_attention.1
= control target key start
LH: loop header
LB: loop body
LE: loop exit
PB: predicated region body
PF: predicated region fallthrough
CT: control target
= control target key end

     0   :  { %s705_s0 = inlined_call_operand.vmem [shape: f32[2,32,256], index: 0, kind: input, shape index: {}]   ;;  %s706_s1 = inlined_call_operand.vmem [shape: f32[2,32], index: 1, kind: input, shape index: {}]   ;;  %s707_s2 = inlined_call_operand.vmem [shape: f32[32,2], index: 2, kind: input, shape index: {}]   ;;  %s708_s3 = inlined_call_operand.hbm [shape: f32[2,32], index: 3, kind: output, shape index: {}]  }
   0x1   :  { %v23_v0 = vld [vmem:[%s705_s0 + $0x40] sm:$0xff]  ;;  %v24_v1 = vld [vmem:[%s705_s0 + $0x48] sm:$0xff]  ;;  %v25_v5 = vld [vmem:[%s705_s0 + $0x50] sm:$0xff] }
   0x2   :  { %v15_v2 = vld [vmem:[%s705_s0] sm:$0xff]  ;;  %v43_v3 = vadd.f32 %v24_v1, %v23_v0  ;;  %v16_v4 = vld [vmem:[%s705_s0 + $0x8] sm:$0xff]  ;;  %v26_v6 = vld [vmem:[%s705_s0 + $0x58] sm:$0xff] }
   0x3   :  { %v31_v7 = vadd.f32 %v16_v4, %v15_v2  ;;  %v17_v8 = vld [vmem:[%s705_s0 + $0x10] sm:$0xff]  ;;  %v18_v9 = vld [vmem:[%s705_s0 + $0x18] sm:$0xff]  ;;  %v46_v10 = vadd.f32 %v26_v6, %v25_v5 }
   0x4   :  { %44 = vadd.xlane.f32.xlu1 %v43_v3  ;;  %v34_v11 = vadd.f32 %v18_v9, %v17_v8 }
   0x5   :  { %32 = vadd.xlane.f32.xlu0 %v31_v7 }
   0x6   :  { %8 = vsyncpa [#allocation5], 0  ;;  %v58_v12 = vmax.f32 %v17_v8, %v18_v9  ;;  %v55_v13 = vmax.f32 %v15_v2, %v16_v4  ;;  %v70_v14 = vmax.f32 %v25_v5, %v26_v6  ;;  %v67_v15 = vmax.f32 %v23_v0, %v24_v1  ;;  %v27_v16 = vld [vmem:[%s705_s0 + $0x60] sm:$0xff]  ;;  %v28_v17 = vld [vmem:[%s705_s0 + $0x68] sm:$0xff] }
   0x7   :  { %v19_v18 = vld [vmem:[%s705_s0 + $0x20] sm:$0xff]  ;;  %v20_v19 = vld [vmem:[%s705_s0 + $0x28] sm:$0xff]  ;;  %v49_v20 = vadd.f32 %v28_v17, %v27_v16  ;;  %v73_v22 = vmax.f32 %v27_v16, %v28_v17  ;;  %v29_v24 = vld [vmem:[%s705_s0 + $0x70] sm:$0xff]  ;;  %vm319_vm0 = vcmask 261120   ;;  %v584_v33 = vmov 0.0  }
   0x8   :  { %47 = vadd.xlane.f32.xlu1 %v46_v10  ;;  %v37_v21 = vadd.f32 %v20_v19, %v19_v18  ;;  %v61_v23 = vmax.f32 %v19_v18, %v20_v19  ;;  %v30_v25 = vld [vmem:[%s705_s0 + $0x78] sm:$0xff]  ;;  %v21_v26 = vld [vmem:[%s705_s0 + $0x30] sm:$0xff]  ;;  %v318_v32 = vld [vmem:[%s706_s1] sm:$0x3]  ;;  %528 = vmatprep.subr.mxu0 %v584_v33  ;;  %vm585_vm1 = vmmov 0   ;;  %vm401_vm2 = vcmask 15360  }
   0x9   :  { %35 = vadd.xlane.f32.xlu0 %v34_v11  ;;  %v22_v27 = vld [vmem:[%s705_s0 + $0x38] sm:$0xff]  ;;  %v52_v28 = vadd.f32 %v30_v25, %v29_v24  ;;  %v76_v30 = vmax.f32 %v29_v24, %v30_v25  ;;  %530 = vmatprep.mubr.msk.f32.mxu0 %vm585_vm1, %v584_v33  ;;  %v397_v34 = vld [vmem:[%s707_s2] sm:$0xff]  ;;  %v398_v35 = vld [vmem:[%s707_s2 + $0x8] sm:$0xff]  ;;  %v586_v36 = vmov 0.0|0.0   ;;  %v91_v45 = vlaneseq }
   0xa   :  { %v40_v29 = vadd.f32 %v22_v27, %v21_v26  ;;  %v64_v31 = vmax.f32 %v21_v26, %v22_v27  ;;  %529 = vmatpush3.xpose.msk.msra.mxu0 %vm319_vm0, %v318_v32  ;;  %541 = vmatprep.mubr.msk.f32.mxu1 %vm585_vm1, %v584_v33  ;;  %v545_v37 = vpack.c.bf16 %v398_v35, %v397_v34  ;;  %vm546_vm3 = vmpackc.low %vm401_vm2, %vm401_vm2  ;;  %v399_v38 = vld [vmem:[%s707_s2 + $0x10] sm:$0xff]  ;;  %v400_v39 = vld [vmem:[%s707_s2 + $0x18] sm:$0xff]  ;;  %vm102_vm4 = vcmask 130112   ;;  %s587_s2 = smov [#allocation4]  }
   0xb   :  { %544 = vmatprep.subr.bf16.mxu1 %v586_v36  ;;  %v549_v40 = vpack.c.bf16 %v400_v39, %v399_v38  ;;  %v92_v48 = vand.u32 127, %v91_v45  ;;  %v94_v52 = vshrl.u32 %v91_v45, 7  ;;  %vm109_vm5 = vcmask 195712   ;;  %s505_s25 = sshll.u32 %s587_s2, 4  ;;  %s506_s25 = int_to_ptr.vmem [resolvable:$true] %s505_s25 }
   0xc   :  { %59 = vmax.xlane.f32.xlu1 %v58_v12  ;;  %547 = vmatpush3.bf16.xpose.msk.msra.mxu1 %vm546_vm3, %v545_v37  ;;  %vm116_vm6 = vcmask 261312   ;;  %vm137_vm7 = vcmask 1041409   ;;  %vm140_vm8 = vcmask 254976   ;;  %vm316_vm9 = vcmask 1041408   ;;  %s560_s26 = scalar_lea.vmem %s506_s25, 32  ;;  %p565_p1 = scmp.lt.s32.totalorder %s506_s25, %s506_s25 }
   0xd   :  { %56 = vmax.xlane.f32.xlu0 %v55_v13  ;;  %548 = vmatprep.subr.bf16.mxu1 %v586_v36  ;;  %v97_v49 = vadd.s32 4294967288, %v92_v48  ;;  %v104_v53 = vadd.s32 4294967280, %v92_v48  ;;  %v111_v57 = vadd.s32 4294967272, %v92_v48  ;;  %v95_v58 = vsub.s32 %v92_v48, %v94_v52  ;;  %p561_p0 = scmp.ne.s32.totalorder %s506_s25, %s560_s26  ;;  %p566_p2 = scmp.lt.s32.totalorder %s560_s26, %s560_s26 }
   0xf   :  { %v100_v54 = vsub.s32 %v97_v49, %v94_v52  ;;  %v107_v59 = vsub.s32 %v104_v53, %v94_v52  ;;  %v114_v0 = vsub.s32 %v111_v57, %v94_v52  ;;  %p567_p3 = por %p566_p2, %p565_p1 }
  0x10   :  { %71 = vmax.xlane.f32.xlu1 %v70_v14 }
  0x11   :  { %68 = vmax.xlane.f32.xlu0 %v67_v15  ;;  %p568_p4 = pnand %p567_p3, %p561_p0 }
  0x14   :  { %50 = vadd.xlane.f32.xlu1 %v49_v20  ;;  %551 = vmatpush3.bf16.xpose.msk.msra.mxu1 %vm546_vm3, %v549_v40 }
  0x15   :  { %38 = vadd.xlane.f32.xlu0 %v37_v21 }
  0x18   :  { %74 = vmax.xlane.f32.xlu1 %v73_v22 }
  0x19   :  { %62 = vmax.xlane.f32.xlu0 %v61_v23 }
  0x1c   :  { %53 = vadd.xlane.f32.xlu1 %v52_v28 }
  0x1d   :  { %41 = vadd.xlane.f32.xlu0 %v40_v29 }
  0x20   :  { %77 = vmax.xlane.f32.xlu1 %v76_v30 }
  0x21   :  { %65 = vmax.xlane.f32.xlu0 %v64_v31 }
  0x91   :  { %v45_v41 = vpop.xlane.xlu1 %44 }
  0x92   :  { %v33_v42 = vpop.xlane.xlu0 %32  ;;  %v121_v1 = vrot.slane %v45_v41, %v95_v58 }
  0x93   :  { %v96_v2 = vrot.slane %v33_v42, %v95_v58 }
  0x95   :  { %v48_v43 = vpop.xlane.xlu1 %47 }
  0x96   :  { %v36_v44 = vpop.xlane.xlu0 %35  ;;  %v125_v60 = vrot.slane %v48_v43, %v100_v54 }
  0x97   :  { %v101_v61 = vrot.slane %v36_v44, %v100_v54 }
  0x98   :  { %v126_v5 = vsel %vm102_vm4, %v125_v60, %v121_v1 }
  0x99   :  { %v60_v46 = vpop.xlane.xlu1 %59  ;;  %v103_v6 = vsel %vm102_vm4, %v101_v61, %v96_v2 }
  0x9a   :  { %v57_v47 = vpop.xlane.xlu0 %56  ;;  %v157_v8 = vrot.slane %v60_v46, %v100_v54 }
  0x9b   :  { %v153_v13 = vrot.slane %v57_v47, %v95_v58 }
  0x9d   :  { %v72_v50 = vpop.xlane.xlu1 %71  ;;  %v158_v26 = vsel %vm102_vm4, %v157_v8, %v153_v13 }
  0x9e   :  { %v69_v51 = vpop.xlane.xlu0 %68  ;;  %v176_v9 = vrot.slane %v72_v50, %v100_v54 }
  0x9f   :  { %v172_v10 = vrot.slane %v69_v51, %v95_v58 }
  0xa1   :  { %v51_v55 = vpop.xlane.xlu1 %50  ;;  %v177_v22 = vsel %vm102_vm4, %v176_v9, %v172_v10 }
  0xa2   :  { %v39_v56 = vpop.xlane.xlu0 %38  ;;  %v130_v3 = vrot.slane %v51_v55, %v107_v59 }
  0xa3   :  { %v108_v4 = vrot.slane %v39_v56, %v107_v59 }
  0xa4   :  { %v131_v14 = vsel %vm109_vm5, %v130_v3, %v126_v5 }
  0xa5   :  { %v75_v62 = vpop.xlane.xlu1 %74  ;;  %v110_v17 = vsel %vm109_vm5, %v108_v4, %v103_v6 }
  0xa6   :  { %v63_v63 = vpop.xlane.xlu0 %62  ;;  %v181_v15 = vrot.slane %v75_v62, %v107_v59 }
  0xa7   :  { %v162_v18 = vrot.slane %v63_v63, %v107_v59 }
  0xa8   :  { %v182_v27 = vsel %vm109_vm5, %v181_v15, %v177_v22 }
  0xa9   :  { %v54_v7 = vpop.xlane.xlu1 %53  ;;  %v163_v29 = vsel %vm109_vm5, %v162_v18, %v158_v26 }
  0xaa   :  { %v135_v11 = vrot.slane %v54_v7, %v114_v0  ;;  %v42_v12 = vpop.xlane.xlu0 %41 }
  0xab   :  { %v115_v16 = vrot.slane %v42_v12, %v114_v0 }
  0xac   :  { %v136_v19 = vsel %vm116_vm6, %v135_v11, %v131_v14 }
  0xad   :  { %v117_v20 = vsel %vm116_vm6, %v115_v16, %v110_v17  ;;  %v78_v21 = vpop.xlane.xlu1 %77 }
  0xae   :  { %v138_v23 = vsel %vm137_vm7, %v136_v19, %v117_v20  ;;  %v186_v24 = vrot.slane %v78_v21, %v114_v0  ;;  %v66_v25 = vpop.xlane.xlu0 %65 }
  0xaf   :  { %141 = vst.msk [vmem:[#allocation2] sm:$0x3] %vm140_vm8, %v138_v23  ;;  %v167_v28 = vrot.slane %v66_v25, %v114_v0 }
  0xb0   :  { %v187_v30 = vsel %vm116_vm6, %v186_v24, %v182_v27 }
  0xb1   :  { %v168_v31 = vsel %vm116_vm6, %v167_v28, %v163_v29 }
  0xb2   :  { %v188_v32 = vsel %vm137_vm7, %v187_v30, %v168_v31 }
  0xb3   :  { %190 = vst.msk [vmem:[#allocation3] sm:$0x3] %vm140_vm8, %v188_v32 }
  0xb6   :  { %v310_v33 = vld [vmem:[#allocation2] sm:$0x3] }
  0xb7   :  { %v311_v35 = vmul.f32 0.00390625, %v310_v33 }
  0xba   :  { %v312_v34 = vld [vmem:[#allocation3] sm:$0x3] }
  0xbb   :  { %v314_v36 = vrot.slane %v312_v34, 6 }
  0xbd   :  { %v317_v37 = vsel %vm316_vm9, %v311_v35, %v314_v36 }
  0xbe   :  { %531 = vmatmul.mubr.msk.f32.vlgmr.msra.gmra.mrb[0].mxu0 %vm319_vm0, %v317_v37 }
 0x191   :  { %v392_v38 = vpop.f32.mrb[0].mxu0 }
 0x192   :  { %v396_v39 = vmax.f32 %v392_v38, 0.0  ;;  %v532_v40 = vpop.f32.mrb[1].mxu0 }
 0x194   :  { %542 = vmatmul.mubr.msk.f32.vlgmr.msra.gmra.mrb[0].mxu1 %vm401_vm2, %v396_v39 }
 0x267   :  { %v483_v41 = vpop.f32.mrb[0].mxu1 }
 0x268   :  { %v488_v42 = vrot.slane %v483_v41, 2  ;;  %v543_v43 = vpop.f32.mrb[1].mxu1 }
 0x26a   :  { %v490_v44 = vadd.f32 %v488_v42, %v483_v41 }
 0x26c   :  { %v520_v45 = vmul.f32 -1.442695, %v490_v44 }
 0x26e   :  { %556 = vpow2.f32 %v520_v45 }
 0x278   :  { %v557_v46 = vpop.eup %556 }
 0x279   :  { %v494_v47 = vadd.f32 1.0, %v557_v46 }
 0x27b   :  { %558 = vrcp.f32 %v494_v47 }
 0x285   :  { %v559_v48 = vpop.eup %558 }
 0x286   :  { %498 = vst.msk [vmem:[#allocation4] sm:$0x3] %vm140_vm8, %v559_v48 }
 0x287   :  { %571 = shalt.err (!%p568_p4)
}
 0x288   :  { %s572_s29 = scalar_lea.hbm %s708_s3, 32 }
 0x289   :  { %p573_p5 = scmp.ne.s32.totalorder %s708_s3, %s572_s29  ;;  %p576_p6 = scmp.lt.u32.totalorder %s572_s29, %s708_s3 }
 0x28b   :  { %p578_p7 = pnand %p576_p6, %p573_p5 }
 0x28d   :  { %581 = shalt.err (!%p578_p7)
}
 0x28e   :  { %508 = dma.vmem_to_hbm [thread:$0]  %s506_s25, 32, %s708_s3, [#allocation5]  }
 0x28f   :  { %582 = dma.done.wait [#allocation5], 32  }
 0x290   :  { %583 = vsyncadd [#allocation5], 4294967264 }
 0x291   :  { %512 = vsyncpa [#allocation5], 1 }

</bundles_post_ra>
